<compile_context>
chip_gen: v6e
topology: v6e:2x2x1
jax: 0.10.0
libtpu: 0.0.40
codegen_flags: <defaults>
</compile_context>

<pallas_src>
import jax
import jax.numpy as jnp
from jax.experimental import pallas as pl
from jax.experimental.pallas import tpu as pltpu


# ---------------------------------------------------------------------------
# Kernel
# ---------------------------------------------------------------------------
def _mlp_block_kernel(a_ref, w1_ref, b1_ref, w2_ref, b2_ref, w3_ref, b3_ref,
                      o_ref):
    """One grid step == one (net-block, batch-tile) pair.

    Shapes inside the kernel (N = nets in block, TB = batch tile, H = hidden):
      a [N,TB,1], w1/b1/b2/w3 [N,1,H], w2 [N,H,H], b3 [N,1], out [N,TB].
    """
    f32 = jnp.float32
    a = a_ref[...].astype(f32)                         # [N, TB, 1]
    w1 = w1_ref[...].astype(f32)                       # [N, 1, H]
    b1 = b1_ref[...].astype(f32)

    # Layer 1: Linear(1, H) + ReLU.  K=1 contraction -> pure broadcast multiply
    # (lane-broadcast of a, sublane-broadcast of W1); no degenerate matmul.
    h1 = jnp.maximum(a * w1 + b1, 0.0)                 # [N, TB, H] f32

    # Layer 2: Linear(H, H) + ReLU, batched over the net block on the MXU.
    # If params are stored bf16, the MXU runs natively in bf16 with f32 acc.
    w2 = w2_ref[...]                                   # [N, H, H]
    h2 = jnp.einsum('nbh,nhk->nbk', h1.astype(w2.dtype), w2,
                    preferred_element_type=f32)        # [N, TB, H] f32 acc
    h2 = jnp.maximum(h2 + b2_ref[...].astype(f32), 0.0)

    # Layer 3: Linear(H, 1) as a lane reduction (w3 is the torch [1,H] weight),
    # then bias; result is the [N, TB] output block.
    # TODO(synk): when H < 128, pack 128/H nets per lane group (block-diagonal
    # layer-2 matmul) to recover VPU/MXU lane utilization.
    w3 = w3_ref[...].astype(f32)                       # [N, 1, H]
    out = jnp.sum(h2 * w3, axis=-1)                    # [N, TB]
    out = out + b3_ref[...].astype(f32)                # b3 [N, 1] broadcast
    o_ref[...] = out.astype(o_ref.dtype)


# ---------------------------------------------------------------------------
# Generation-aware sizing helpers
# ---------------------------------------------------------------------------
def _tpu_generation():
    """Returns (physical VMEM bytes per TensorCore, TensorCores per chip)."""
    vmem_bytes = None
    num_tc = None
    try:
        info = pltpu.get_tpu_info()
        for name in ("vmem_capacity_bytes", "vmem_bytes", "vmem_size_bytes"):
            v = getattr(info, name, None)
            if v:
                vmem_bytes = int(v)
                break
        for name in ("num_tensorcores", "tensorcores_per_chip", "num_cores",
                     "core_count"):
            v = getattr(info, name, None)
            if v and int(v) <= 8:
                num_tc = int(v)
                break
    except Exception:
        pass
    kind = ""
    try:
        kind = jax.devices()[0].device_kind.lower()
    except Exception:
        pass
    if vmem_bytes is None:
        if "v2" in kind or "v3" in kind:
            vmem_bytes = 16 * 1024 * 1024
        elif "7" in kind or not kind:       # v7x: 64 MiB / TC; unknown: be safe
            vmem_bytes = 64 * 1024 * 1024
        else:                               # v4 / v5e / v5p / v6e: 128 MiB
            vmem_bytes = 128 * 1024 * 1024
    elif "7" in kind:
        vmem_bytes = min(vmem_bytes, 64 * 1024 * 1024)
    if num_tc is None:
        num_tc = 2 if ("7" in kind or "v4" in kind or "v5p" in kind) else 1
    num_tc = max(1, min(int(num_tc), 2))
    return int(vmem_bytes), num_tc


def _working_budget(vmem_bytes):
    # ~24 MiB on v7x (64 MiB physical), 48 MiB on 128 MiB parts, >= 8 MiB floor.
    return max(8 * 1024 * 1024,
               min(vmem_bytes // 2 - 8 * 1024 * 1024, 48 * 1024 * 1024))


def _padded_bytes(shape, itemsize):
    """VMEM footprint of one block, accounting for (sublane, 128-lane) tiling."""
    s = [int(d) for d in shape]
    if not s:
        return itemsize
    s[-1] = pl.cdiv(s[-1], 128) * 128
    if len(s) >= 2:
        q = max(8, 32 // max(1, itemsize))   # 8 f32 / 16 bf16 / 32 int8
        s[-2] = pl.cdiv(s[-2], q) * q
    n = 1
    for d in s:
        n *= d
    return n * itemsize


def _vmem_estimate(nblk, tb, H, itemsize):
    """Conservative per-step VMEM bytes (double-buffered I/O + f32 temporaries)."""
    io = (_padded_bytes((nblk, tb, 1), itemsize)        # a
          + 4 * _padded_bytes((nblk, 1, H), itemsize)   # w1, b1, b2, w3
          + _padded_bytes((nblk, H, H), itemsize)       # w2 (dominant stream)
          + _padded_bytes((nblk, 1), itemsize)          # b3
          + _padded_bytes((nblk, tb), itemsize))        # out
    tmp = 3 * _padded_bytes((nblk, tb, H), 4)           # h1, h2 (+ cast slack)
    return 2 * io + tmp + (1 << 20)                     # + 1 MiB misc slack


def _choose_blocks(n_nets, B, H, itemsize, budget_bytes, num_tc):
    """Pick (nets-per-step, batch-tile) that fit the budget.

    nblk must divide n_nets and be a multiple of the sublane quantum (or equal
    n_nets); tb must divide B and be a multiple of 128 (or equal B) so the
    output store stays lane-dense whenever B >= 128.  Never returns a block
    that fails the budget when any admissible block fits it.
    """
    sub_q = max(8, 32 // max(1, itemsize))
    nblk_cands = sorted(
        {n_nets} | {d for d in range(sub_q, n_nets, sub_q) if n_nets % d == 0})
    tb_all = sorted({B} | {d for d in range(128, B, 128) if B % d == 0})
    tb_cands = [t for t in tb_all if t <= 512] or [tb_all[0]]

    best = None
    for tb in sorted(tb_cands, reverse=True):
        fitting = [nb for nb in nblk_cands
                   if _vmem_estimate(nb, tb, H, itemsize) <= budget_bytes]
        if not fitting:
            continue
        # Prefer >= num_tc (ideally a multiple of num_tc) net-blocks so the
        # "parallel" net axis keeps both TensorCores busy on v7x.
        multi = [nb for nb in fitting if (n_nets // nb) >= num_tc]
        even = [nb for nb in multi if (n_nets // nb) % num_tc == 0]
        pool = even or multi or fitting
        best = (max(pool), tb)
        break
    if best is None:   # nothing fits: smallest blocks; vmem_limit raised below
        best = (nblk_cands[0], tb_cands[0])
    nblk, tb = best
    return nblk, tb, _vmem_estimate(nblk, tb, H, itemsize)


# ---------------------------------------------------------------------------
# Wrapper
# ---------------------------------------------------------------------------
def batch_q_approx_forward(a, params):
    """a: [n_nets, B, 1] -> [n_nets, B] (matches torch forward + squeeze + stack).

    Expected (net-major) param layout:
      w1 [n,1,H]  (torch Linear(1,H).weight [H,1], transposed)
      b1 [n,1,H]
      w2 [n,H,H]  ([in,out] = torch Linear(H,H).weight transposed)
      b2 [n,1,H]
      w3 [n,1,H]  (torch Linear(H,1).weight [1,H], as-is; legacy [n,H,1] accepted)
      b3 [n,1]    (legacy [n,1,1] accepted)
    """
    w1, b1, w2, b2, w3, b3 = params
    n_nets, B, _ = a.shape
    H = w1.shape[-1]

    # Normalize legacy layouts (one-time, wrapper-side layout plumbing only).
    if w3.shape[-2:] == (H, 1):
        w3 = jnp.swapaxes(w3, -1, -2)
    b3 = jnp.reshape(b3, (n_nets, 1))

    vmem_bytes, num_tc = _tpu_generation()
    budget = _working_budget(vmem_bytes)
    itemsize = jnp.dtype(a.dtype).itemsize
    nblk, tb, est = _choose_blocks(n_nets, B, H, itemsize, budget, num_tc)
    vmem_limit = int(min(vmem_bytes * 9 // 10,
                         max(32 * 1024 * 1024, int(est * 1.25))))

    grid = (n_nets // nblk, B // tb)  # batch axis last: weights resident over it

    # NOTE: per-net weight index maps ignore the batch-tile index j, so W1/b1/
    # W2/b2/W3/b3 are DMA'd once per net-block and stay resident while a / out
    # tiles stream.  (TODO(synk): lane-dense flattened store for B < 128 and
    # pl.Buffered(3) on the W2 spec are possible follow-up sweeps.)
    out = pl.pallas_call(
        _mlp_block_kernel,
        out_shape=jax.ShapeDtypeStruct((n_nets, B), a.dtype),
        grid=grid,
        in_specs=[
            pl.BlockSpec((nblk, tb, 1), lambda i, j: (i, j, 0)),   # a
            pl.BlockSpec((nblk, 1, H), lambda i, j: (i, 0, 0)),    # W1
            pl.BlockSpec((nblk, 1, H), lambda i, j: (i, 0, 0)),    # b1
            pl.BlockSpec((nblk, H, H), lambda i, j: (i, 0, 0)),    # W2 (resident)
            pl.BlockSpec((nblk, 1, H), lambda i, j: (i, 0, 0)),    # b2
            pl.BlockSpec((nblk, 1, H), lambda i, j: (i, 0, 0)),    # W3
            pl.BlockSpec((nblk, 1), lambda i, j: (i, 0)),          # b3
        ],
        out_specs=pl.BlockSpec((nblk, tb), lambda i, j: (i, j)),
        compiler_params=pltpu.CompilerParams(
            dimension_semantics=("parallel", "arbitrary"),
            vmem_limit_bytes=vmem_limit),
    )(a, w1, b1, w2, b2, w3, b3)
    return out


# ---------------------------------------------------------------------------
# Params / reference / demo
# ---------------------------------------------------------------------------
def init_params(key, n_nets, hidden, dtype=jnp.float32):
    """Deterministic init mimicking torch.nn.Linear (uniform(-1/sqrt(fan_in), ..)).

    W3 is stored pre-transposed ([n,1,H], the native torch [1,H] weight layout)
    and b3 as 2-D [n,1] so the forward pass needs no per-call layout fixups.
    """
    ks = jax.random.split(key, 6)
    k1 = 1.0 / jnp.sqrt(1.0)        # fan_in = 1
    k2 = 1.0 / jnp.sqrt(hidden)     # fan_in = hidden
    k3 = 1.0 / jnp.sqrt(hidden)     # fan_in = hidden
    w1 = jax.random.uniform(ks[0], (n_nets, 1, hidden), dtype, -k1, k1)
    b1 = jax.random.uniform(ks[1], (n_nets, 1, hidden), dtype, -k1, k1)
    w2 = jax.random.uniform(ks[2], (n_nets, hidden, hidden), dtype, -k2, k2)
    b2 = jax.random.uniform(ks[3], (n_nets, 1, hidden), dtype, -k2, k2)
    w3 = jax.random.uniform(ks[4], (n_nets, 1, hidden), dtype, -k3, k3)
    b3 = jax.random.uniform(ks[5], (n_nets, 1), dtype, -k3, k3)
    return (w1, b1, w2, b2, w3, b3)


def reference_forward(a, params):
    """Plain-JAX reference matching the PyTorch module semantics (f32)."""
    w1, b1, w2, b2, w3, b3 = params
    h1 = jnp.maximum(jnp.einsum('nbi,nih->nbh', a, w1) + b1, 0.0)
    h2 = jnp.maximum(jnp.einsum('nbh,nhk->nbk', h1, w2) + b2, 0.0)
    o = jnp.einsum('nbh,nh->nb', h2, w3[:, 0, :]) + b3
    return o   # [n_nets, B]


if __name__ == "__main__":
    n_nets, B, hidden = 4, 8, 32

    key = jax.random.PRNGKey(0)
    k_params, k_a = jax.random.split(key)
    params = init_params(k_params, n_nets, hidden)
    a = jax.random.normal(k_a, (n_nets, B, 1), jnp.float32)

    out = batch_q_approx_forward(a, params)
    out = jax.block_until_ready(out)

    ref = reference_forward(a, params)
    assert out.shape == (n_nets, B), out.shape
    assert jnp.allclose(out, ref, rtol=1e-4, atol=1e-4), "mismatch vs reference"

    print("KERNEL_OK")
</pallas_src>

<mosaic_0001>
module attributes {stable_mosaic.version = 11 : i64} {
  func.func @_mlp_block_kernel(%arg0: i32, %arg1: i32, %arg2: memref<4x8x1xf32, #tpu.memory_space<vmem>>, %arg3: memref<4x1x32xf32, #tpu.memory_space<vmem>>, %arg4: memref<4x1x32xf32, #tpu.memory_space<vmem>>, %arg5: memref<4x32x32xf32, #tpu.memory_space<vmem>>, %arg6: memref<4x1x32xf32, #tpu.memory_space<vmem>>, %arg7: memref<4x1x32xf32, #tpu.memory_space<vmem>>, %arg8: memref<4x1xf32, #tpu.memory_space<vmem>>, %arg9: memref<4x8xf32, #tpu.memory_space<vmem>>) attributes {dimension_semantics = [#tpu.dimension_semantics<parallel>, #tpu.dimension_semantics<arbitrary>], iteration_bounds = array<i64: 1, 1>, scalar_prefetch = 0 : i64, scratch_operands = 0 : i64, tpu.core_type = #tpu.core_type<tc>, window_params = [{transform_indices = @transform_0, window_bounds = array<i64: 4, 8, 1>}, {transform_indices = @transform_1, window_bounds = array<i64: 4, 1, 32>}, {transform_indices = @transform_2, window_bounds = array<i64: 4, 1, 32>}, {transform_indices = @transform_3, window_bounds = array<i64: 4, 32, 32>}, {transform_indices = @transform_4, window_bounds = array<i64: 4, 1, 32>}, {transform_indices = @transform_5, window_bounds = array<i64: 4, 1, 32>}, {transform_indices = @transform_6, window_bounds = array<i64: 4, 1>}, {transform_indices = @transform_7, window_bounds = array<i64: 4, 8>}]} {
    %c0 = arith.constant 0 : index
    %c0_0 = arith.constant 0 : index
    %c0_1 = arith.constant 0 : index
    %0 = vector.load %arg2[%c0, %c0_0, %c0_1] : memref<4x8x1xf32, #tpu.memory_space<vmem>>, vector<4x8x1xf32>
    %c0_2 = arith.constant 0 : index
    %c0_3 = arith.constant 0 : index
    %c0_4 = arith.constant 0 : index
    %1 = vector.load %arg3[%c0_2, %c0_3, %c0_4] : memref<4x1x32xf32, #tpu.memory_space<vmem>>, vector<4x1x32xf32>
    %c0_5 = arith.constant 0 : index
    %c0_6 = arith.constant 0 : index
    %c0_7 = arith.constant 0 : index
    %2 = vector.load %arg4[%c0_5, %c0_6, %c0_7] : memref<4x1x32xf32, #tpu.memory_space<vmem>>, vector<4x1x32xf32>
    %3 = vector.broadcast %0 : vector<4x8x1xf32> to vector<4x8x32xf32>
    %4 = vector.broadcast %1 : vector<4x1x32xf32> to vector<4x8x32xf32>
    %5 = arith.mulf %3, %4 : vector<4x8x32xf32>
    %6 = vector.broadcast %2 : vector<4x1x32xf32> to vector<4x8x32xf32>
    %7 = arith.addf %5, %6 : vector<4x8x32xf32>
    %cst = arith.constant 0.000000e+00 : f32
    %8 = vector.broadcast %cst : f32 to vector<4x8x32xf32>
    %9 = arith.maximumf %7, %8 : vector<4x8x32xf32>
    %c0_8 = arith.constant 0 : index
    %c0_9 = arith.constant 0 : index
    %c0_10 = arith.constant 0 : index
    %10 = vector.load %arg5[%c0_8, %c0_9, %c0_10] : memref<4x32x32xf32, #tpu.memory_space<vmem>>, vector<4x32x32xf32>
    "tpu.trace_start"() <{level = 10 : i32, message = "nbh,nhk->nbk"}> : () -> ()
    %cst_11 = arith.constant dense<0.000000e+00> : vector<4x8x32xf32>
    %11 = tpu.matmul %9, %10, %cst_11 {dimension_numbers = #tpu.dot_dimension_numbers<[2], [1], [1], [2], [0, 0, 0, 1, 1, 2], [0], [0]>} : vector<4x8x32xf32>, vector<4x32x32xf32>, vector<4x8x32xf32> -> vector<4x8x32xf32>
    "tpu.trace_stop"() : () -> ()
    %c0_12 = arith.constant 0 : index
    %c0_13 = arith.constant 0 : index
    %c0_14 = arith.constant 0 : index
    %12 = vector.load %arg6[%c0_12, %c0_13, %c0_14] : memref<4x1x32xf32, #tpu.memory_space<vmem>>, vector<4x1x32xf32>
    %13 = vector.broadcast %12 : vector<4x1x32xf32> to vector<4x8x32xf32>
    %14 = arith.addf %11, %13 : vector<4x8x32xf32>
    %cst_15 = arith.constant 0.000000e+00 : f32
    %15 = vector.broadcast %cst_15 : f32 to vector<4x8x32xf32>
    %16 = arith.maximumf %14, %15 : vector<4x8x32xf32>
    %c0_16 = arith.constant 0 : index
    %c0_17 = arith.constant 0 : index
    %c0_18 = arith.constant 0 : index
    %17 = vector.load %arg7[%c0_16, %c0_17, %c0_18] : memref<4x1x32xf32, #tpu.memory_space<vmem>>, vector<4x1x32xf32>
    %18 = vector.broadcast %17 : vector<4x1x32xf32> to vector<4x8x32xf32>
    %19 = arith.mulf %16, %18 : vector<4x8x32xf32>
    %cst_19 = arith.constant dense<0.000000e+00> : vector<4x8xf32>
    %20 = vector.multi_reduction <add>, %19, %cst_19 [2] : vector<4x8x32xf32> to vector<4x8xf32>
    %c0_20 = arith.constant 0 : index
    %c0_21 = arith.constant 0 : index
    %21 = vector.load %arg8[%c0_20, %c0_21] : memref<4x1xf32, #tpu.memory_space<vmem>>, vector<4x1xf32>
    %22 = vector.broadcast %21 : vector<4x1xf32> to vector<4x8xf32>
    %23 = arith.addf %20, %22 : vector<4x8xf32>
    %c0_22 = arith.constant 0 : index
    %c0_23 = arith.constant 0 : index
    %24 = vector.load %arg9[%c0_22, %c0_23] : memref<4x8xf32, #tpu.memory_space<vmem>>, vector<4x8xf32>
    tpu.vector_store %arg9[%c0_22, %c0_23], %23 {strides = array<i32>} : memref<4x8xf32, #tpu.memory_space<vmem>>, vector<4x8xf32>,
    return
  }
  func.func @transform_0(%arg0: i32, %arg1: i32) -> (i32, i32, i32) {
    %c0_i32 = arith.constant 0 : i32
    %c0_i32_0 = arith.constant 0 : i32
    return %arg0, %arg1, %c0_i32 : i32, i32, i32
  }
  func.func @transform_1(%arg0: i32, %arg1: i32) -> (i32, i32, i32) {
    %c0_i32 = arith.constant 0 : i32
    %c0_i32_0 = arith.constant 0 : i32
    %c0_i32_1 = arith.constant 0 : i32
    return %arg0, %c0_i32, %c0_i32_0 : i32, i32, i32
  }
  func.func @transform_2(%arg0: i32, %arg1: i32) -> (i32, i32, i32) {
    %c0_i32 = arith.constant 0 : i32
    %c0_i32_0 = arith.constant 0 : i32
    %c0_i32_1 = arith.constant 0 : i32
    return %arg0, %c0_i32, %c0_i32_0 : i32, i32, i32
  }
  func.func @transform_3(%arg0: i32, %arg1: i32) -> (i32, i32, i32) {
    %c0_i32 = arith.constant 0 : i32
    %c0_i32_0 = arith.constant 0 : i32
    %c0_i32_1 = arith.constant 0 : i32
    return %arg0, %c0_i32, %c0_i32_0 : i32, i32, i32
  }
  func.func @transform_4(%arg0: i32, %arg1: i32) -> (i32, i32, i32) {
    %c0_i32 = arith.constant 0 : i32
    %c0_i32_0 = arith.constant 0 : i32
    %c0_i32_1 = arith.constant 0 : i32
    return %arg0, %c0_i32, %c0_i32_0 : i32, i32, i32
  }
  func.func @transform_5(%arg0: i32, %arg1: i32) -> (i32, i32, i32) {
    %c0_i32 = arith.constant 0 : i32
    %c0_i32_0 = arith.constant 0 : i32
    %c0_i32_1 = arith.constant 0 : i32
    return %arg0, %c0_i32, %c0_i32_0 : i32, i32, i32
  }
  func.func @transform_6(%arg0: i32, %arg1: i32) -> (i32, i32) {
    %c0_i32 = arith.constant 0 : i32
    %c0_i32_0 = arith.constant 0 : i32
    return %arg0, %c0_i32 : i32, i32
  }
  func.func @transform_7(%arg0: i32, %arg1: i32) -> (i32, i32) {
    %c0_i32 = arith.constant 0 : i32
    return %arg0, %arg1 : i32, i32
  }
}

</mosaic_0001>

<bundles_post_ra>
// kernel: tpu_custom_call.1
= control target key start
LH: loop header
LB: loop body
LE: loop exit
PB: predicated region body
PF: predicated region fallthrough
CT: control target
= control target key end

     0   :  { %12 = vsyncpa [#allocation3], 0  ;;  %s890_s0 = inlined_call_operand.vmem [shape: f32[4,8,1], index: 0, kind: input, shape index: {}]   ;;  %s891_s1 = inlined_call_operand.vmem [shape: f32[4,1,32], index: 1, kind: input, shape index: {}]   ;;  %s892_s2 = inlined_call_operand.vmem [shape: f32[4,1,32], index: 2, kind: input, shape index: {}]   ;;  %s893_s3 = inlined_call_operand.hbm [shape: f32[4,32,32], index: 3, kind: input, shape index: {}]   ;;  %s894_s4 = inlined_call_operand.vmem [shape: f32[4,1,32], index: 4, kind: input, shape index: {}]   ;;  %s895_s5 = inlined_call_operand.vmem [shape: f32[4,1,32], index: 5, kind: input, shape index: {}]   ;;  %s896_s6 = inlined_call_operand.vmem [shape: f32[4,1], index: 6, kind: input, shape index: {}]   ;;  %s897_s7 = inlined_call_operand.hbm [shape: f32[4,8], index: 7, kind: output, shape index: {}]  }
   0x1   :  { %13 = vsyncpa [#allocation4], 0  ;;  %s742_s24 = smov [#allocation2]  }
   0x2   :  { %s25_s25 = sshll.u32 %s742_s24, 4  ;;  %s26_s25 = int_to_ptr.vmem [resolvable:$true] %s25_s25 }
   0x3   :  { %s706_s26 = scalar_lea.vmem %s26_s25, 2048  ;;  %p711_p1 = scmp.lt.s32.totalorder %s26_s25, %s26_s25 }
   0x4   :  { %p707_p0 = scmp.ne.s32.totalorder %s26_s25, %s706_s26  ;;  %p712_p2 = scmp.lt.s32.totalorder %s706_s26, %s706_s26 }
   0x6   :  { %p713_p3 = por %p712_p2, %p711_p1 }
   0x8   :  { %p714_p4 = pnand %p713_p3, %p707_p0 }
   0xa   :  { %717 = shalt.err (!%p714_p4)
}
   0xb   :  { %s743_s27 = smov 128   ;;  %s744_s28 = smov 8  }
   0xc   :  { %31 = dma.hbm_to_vmem [thread:$0]  %s893_s3, 2048, %s26_s25, [#allocation3], %s743_s27, %s743_s27, %s744_s28  }
   0xd   :  { %738 = dma.done.wait [#allocation3], 2048  }
   0xe   :  { %739 = vsyncadd [#allocation3], 4294965248  ;;  %v745_v0 = vmov 0   ;;  %v746_v1 = vmov 0.0   ;;  %v41_v2 = vld [vmem:[%s890_s0] sm:$0xff]  ;;  %v43_v3 = vld [vmem:[%s890_s0 + $0x10] sm:$0xff] }
   0xf   :  { %696 = vset.pattern.permute.xlu0 %v745_v0  ;;  %697 = vset.pattern.permute.xlu1 %v745_v0  ;;  %v136_v4 = vld [vmem:[#allocation2 + $0x18] sm:$0xff]  ;;  %v42_v5 = vld [vmem:[%s890_s0 + $0x8] sm:$0xff]  ;;  %v135_v7 = vld [vmem:[#allocation2 + $0x10] sm:$0xff]  ;;  %vm747_vm0 = vmmov 0   ;;  %vm177_vm1 = vcmask 261120   ;;  %vm581_vm2 = vcmask 1041409  }
  0x10   :  { %645 = vmatprep.subr.mxu0 %v746_v1  ;;  %656 = vmatprep.subr.mxu1 %v746_v1  ;;  %v44_v6 = vld [vmem:[%s890_s0 + $0x18] sm:$0xff]  ;;  %v134_v9 = vld [vmem:[#allocation2 + $0x8] sm:$0xff]  ;;  %v139_v10 = vld [vmem:[#allocation2 + $0x30] sm:$0xff]  ;;  %vm583_vm3 = vcmask 1042434   ;;  %vm585_vm4 = vcmask 1043459   ;;  %vm588_vm5 = vcmask 60416  }
  0x11   :  { %55 = vperm.xlu0 %696, %v41_v2   ;;  %65 = vperm.xlu1 %697, %v43_v3   ;;  %v140_v8 = vld [vmem:[#allocation2 + $0x38] sm:$0xff]  ;;  %v133_v11 = vld [vmem:[#allocation2] sm:$0xff]  ;;  %v138_v12 = vld [vmem:[#allocation2 + $0x28] sm:$0xff] }
  0x12   :  { %646 = vmatpush3.msra.mxu0 %v136_v4  ;;  %653 = vmatprep.mubr.msk.f32.mxu0 %vm747_vm0, %v746_v1  ;;  %v137_v13 = vld [vmem:[#allocation2 + $0x20] sm:$0xff]  ;;  %v144_v30 = vld [vmem:[#allocation2 + $0x58] sm:$0xff]  ;;  %v143_v33 = vld [vmem:[#allocation2 + $0x50] sm:$0xff] }
  0x13   :  { %647 = vmatprep.subr.mxu0 %v746_v1  ;;  %664 = vmatprep.mubr.msk.f32.mxu1 %vm747_vm0, %v746_v1  ;;  %v605_v14 = vld [vmem:[%s891_s1] ss:$0 sm:$0xff]  ;;  %v607_v17 = vld [vmem:[%s891_s1 + $0x2] ss:$0 sm:$0xff]  ;;  %v606_v20 = vld [vmem:[%s891_s1 + $0x1] ss:$0 sm:$0xff] }
  0x14   :  { %648 = vmatpush3.msra.mxu0 %v135_v7  ;;  %657 = vmatpush3.msra.mxu1 %v140_v8  ;;  %v609_v15 = vld [vmem:[%s892_s2] ss:$0 sm:$0xff]  ;;  %v610_v23 = vld [vmem:[%s892_s2 + $0x1] ss:$0 sm:$0xff]  ;;  %v611_v25 = vld [vmem:[%s892_s2 + $0x2] ss:$0 sm:$0xff] }
  0x15   :  { %60 = vperm.xlu0 %696, %v42_v5   ;;  %70 = vperm.xlu1 %697, %v44_v6   ;;  %v608_v26 = vld [vmem:[%s891_s1 + $0x3] ss:$0 sm:$0xff]  ;;  %v142_v37 = vld [vmem:[#allocation2 + $0x48] sm:$0xff]  ;;  %v148_v38 = vld [vmem:[#allocation2 + $0x78] sm:$0xff] }
  0x16   :  { %649 = vmatprep.subr.mxu0 %v746_v1  ;;  %658 = vmatprep.subr.mxu1 %v746_v1  ;;  %v612_v35 = vld [vmem:[%s892_s2 + $0x3] ss:$0 sm:$0xff]  ;;  %v147_v42 = vld [vmem:[#allocation2 + $0x70] sm:$0xff]  ;;  %v146_v43 = vld [vmem:[#allocation2 + $0x68] sm:$0xff] }
  0x17   :  { %650 = vmatpush3.msra.mxu0 %v134_v9  ;;  %659 = vmatpush3.msra.mxu1 %v139_v10  ;;  %v141_v41 = vld [vmem:[#allocation2 + $0x40] sm:$0xff] }
  0x18   :  { %651 = vmatprep.subr.mxu0 %v746_v1  ;;  %660 = vmatprep.subr.mxu1 %v746_v1  ;;  %v145_v45 = vld [vmem:[#allocation2 + $0x60] sm:$0xff] }
  0x19   :  { %652 = vmatpush3.msra.mxu0 %v133_v11  ;;  %661 = vmatpush3.msra.mxu1 %v138_v12  ;;  %v613_v46 = vld [vmem:[%s894_s4] ss:$0 sm:$0xff]  ;;  %v614_v50 = vld [vmem:[%s894_s4 + $0x1] ss:$0 sm:$0xff]  ;;  %v615_v57 = vld [vmem:[%s894_s4 + $0x2] ss:$0 sm:$0xff] }
  0x1a   :  { %667 = vmatprep.subr.mxu0 %v746_v1  ;;  %662 = vmatprep.subr.mxu1 %v746_v1  ;;  %v621_v51 = vld [vmem:[%s895_s5] ss:$0 sm:$0xff]  ;;  %v622_v58 = vld [vmem:[%s895_s5 + $0x1] ss:$0 sm:$0xff]  ;;  %v623_v2 = vld [vmem:[%s895_s5 + $0x2] ss:$0 sm:$0xff] }
  0x1b   :  { %663 = vmatpush3.msra.mxu1 %v137_v13  ;;  %v624_v9 = vld [vmem:[%s895_s5 + $0x3] ss:$0 sm:$0xff]  ;;  %s748_s5 = smov [#allocation5]  }
  0x1c   :  { %678 = vmatprep.subr.mxu1 %v746_v1 }
  0x8c   :  { %v56_v16 = vpop.permute.xlu0 %55  ;;  %v66_v18 = vpop.permute.xlu1 %65 }
  0x8d   :  { %v97_v19 = vmul.f32 %v605_v14, %v56_v16  ;;  %v99_v22 = vmul.f32 %v607_v17, %v66_v18  ;;  %v518_v14 = vld [vmem:[%s896_s6] sm:$0xf]  ;;  %s596_s6 = sshll.u32 %s748_s5, 4  ;;  %s597_s6 = int_to_ptr.vmem [resolvable:$true] %s596_s6 }
  0x8e   :  { %s718_s20 = scalar_lea.vmem %s597_s6, 64  ;;  %p723_p6 = scmp.lt.s32.totalorder %s597_s6, %s597_s6 }
  0x8f   :  { %v125_v21 = vadd.f32 %v609_v15, %v97_v19  ;;  %v127_v32 = vadd.f32 %v611_v25, %v99_v22  ;;  %v523_v15 = vlaneseq  ;;  %p719_p5 = scmp.ne.s32.totalorder %s597_s6, %s718_s20  ;;  %p724_p7 = scmp.lt.s32.totalorder %s718_s20, %s718_s20 }
  0x90   :  { %v61_v24 = vpop.permute.xlu0 %60  ;;  %v71_v27 = vpop.permute.xlu1 %70 }
  0x91   :  { %v129_v28 = vmax.f32 %v125_v21, 0.0  ;;  %v98_v29 = vmul.f32 %v606_v20, %v61_v24  ;;  %v100_v34 = vmul.f32 %v608_v26, %v71_v27  ;;  %v131_v39 = vmax.f32 %v127_v32, 0.0  ;;  %p725_p8 = por %p724_p7, %p723_p6 }
  0x92   :  { %v524_v16 = vshrl.u32 %v523_v15, 7  ;;  %v564_v17 = vand.u32 127, %v523_v15 }
  0x93   :  { %v126_v31 = vadd.f32 %v610_v23, %v98_v29  ;;  %654 = vmatmul.mubr.msk.f32.vlgmr.msra.gmra.mxu0 %vm177_vm1, %v129_v28  ;;  %v128_v40 = vadd.f32 %v612_v35, %v100_v34  ;;  %p726_p9 = pnand %p725_p8, %p719_p5 }
  0x94   :  { %668 = vmatpush3.msra.mxu0 %v144_v30  ;;  %675 = vmatprep.mubr.msk.f32.mxu0 %vm747_vm0, %v746_v1  ;;  %v567_v18 = vsub.s32 %v564_v17, %v524_v16  ;;  %v525_v21 = vsub.s32 0, %v524_v16  ;;  %v529_v22 = vsub.s32 1, %v524_v16  ;;  %v533_v23 = vsub.s32 2, %v524_v16 }
  0x95   :  { %v130_v36 = vmax.f32 %v126_v31, 0.0  ;;  %669 = vmatprep.subr.mxu0 %v746_v1  ;;  %v132_v44 = vmax.f32 %v128_v40, 0.0  ;;  %v537_v24 = vsub.s32 3, %v524_v16 }
  0x96   :  { %670 = vmatpush3.msra.mxu0 %v143_v33 }
  0x97   :  { %671 = vmatprep.subr.mxu0 %v746_v1  ;;  %665 = vmatmul.mubr.msk.f32.vlgmr.msra.gmra.mxu1 %vm177_vm1, %v130_v36 }
  0x98   :  { %672 = vmatpush3.msra.mxu0 %v142_v37  ;;  %679 = vmatpush3.msra.mxu1 %v148_v38 }
  0x99   :  { %673 = vmatprep.subr.mxu0 %v746_v1  ;;  %680 = vmatprep.subr.mxu1 %v746_v1 }
  0x9a   :  { %674 = vmatpush3.msra.mxu0 %v141_v41  ;;  %681 = vmatpush3.msra.mxu1 %v147_v42 }
  0x9b   :  { %676 = vmatmul.mubr.msk.f32.vlgmr.msra.gmra.mxu0 %vm177_vm1, %v131_v39  ;;  %682 = vmatprep.subr.mxu1 %v746_v1 }
  0x9c   :  { %683 = vmatpush3.msra.mxu1 %v146_v43  ;;  %686 = vmatprep.mubr.msk.f32.mxu1 %vm747_vm0, %v746_v1 }
  0x9d   :  { %684 = vmatprep.subr.mxu1 %v746_v1  ;;  %v616_v1 = vld [vmem:[%s894_s4 + $0x3] ss:$0 sm:$0xff] }
  0x9e   :  { %685 = vmatpush3.msra.mxu1 %v145_v45 }
  0x9f   :  { %687 = vmatmul.mubr.msk.f32.vlgmr.msra.gmra.mxu1 %vm177_vm1, %v132_v44 }
 0x153   :  { %v247_v47 = vpop.f32.mrf.mxu0 }
 0x154   :  { %v248_v48 = vadd.f32 %v613_v46, %v247_v47 }
 0x155   :  { %v655_v49 = vpop.f32.mrf.mxu0 }
 0x156   :  { %v470_v52 = vmax.f32 %v248_v48, 0.0 }
 0x157   :  { %v320_v53 = vpop.f32.mrf.mxu1 }
 0x158   :  { %v321_v54 = vadd.f32 %v614_v50, %v320_v53  ;;  %v502_v55 = vmul.f32 %v621_v51, %v470_v52 }
 0x159   :  { %v666_v56 = vpop.f32.mrf.mxu1 }
 0x15a   :  { %v471_v59 = vmax.f32 %v321_v54, 0.0  ;;  %v506_v60 = vsel %vm177_vm1, %v502_v55, 0.0 }
 0x15b   :  { %v393_v61 = vpop.f32.mrf.mxu0  ;;  %507 = vadd.xlane.f32.xlu0 %v506_v60 }
 0x15c   :  { %v394_v62 = vadd.f32 %v615_v57, %v393_v61  ;;  %v503_v63 = vmul.f32 %v622_v58, %v471_v59 }
 0x15d   :  { %v677_v0 = vpop.f32.mrf.mxu0 }
 0x15e   :  { %v472_v3 = vmax.f32 %v394_v62, 0.0  ;;  %v509_v4 = vsel %vm177_vm1, %v503_v63, 0.0 }
 0x15f   :  { %v466_v5 = vpop.f32.mrf.mxu1  ;;  %510 = vadd.xlane.f32.xlu1 %v509_v4 }
 0x160   :  { %v467_v6 = vadd.f32 %v616_v1, %v466_v5  ;;  %v504_v7 = vmul.f32 %v623_v2, %v472_v3 }
 0x161   :  { %v688_v8 = vpop.f32.mrf.mxu1 }
 0x162   :  { %v473_v10 = vmax.f32 %v467_v6, 0.0  ;;  %v512_v11 = vsel %vm177_vm1, %v504_v7, 0.0 }
 0x163   :  { %513 = vadd.xlane.f32.xlu0 %v512_v11 }
 0x164   :  { %v505_v12 = vmul.f32 %v624_v9, %v473_v10 }
 0x166   :  { %v515_v13 = vsel %vm177_vm1, %v505_v12, 0.0 }
 0x167   :  { %516 = vadd.xlane.f32.xlu0 %v515_v13 }
 0x170   :  { %521 = vperm.xlu1 %697, %v518_v14  }
 0x1e4   :  { %v508_v19 = vpop.xlane.xlu0 %507 }
 0x1e8   :  { %v511_v20 = vpop.xlane.xlu1 %510 }
 0x1ec   :  { %v514_v25 = vpop.xlane.xlu0 %513  ;;  %v522_v26 = vpop.permute.xlu1 %521 }
 0x1ed   :  { %v526_v27 = vrot.slane %v522_v26, %v525_v21  ;;  %v530_v28 = vrot.slane %v522_v26, %v529_v22  ;;  %v534_v29 = vrot.slane %v522_v26, %v533_v23  ;;  %v538_v30 = vrot.slane %v522_v26, %v537_v24 }
 0x1ef   :  { %v544_v31 = vadd.f32 %v530_v28, %v511_v20  ;;  %v543_v32 = vadd.f32 %v526_v27, %v508_v19  ;;  %v545_v35 = vadd.f32 %v534_v29, %v514_v25 }
 0x1f0   :  { %v517_v33 = vpop.xlane.xlu0 %516 }
 0x1f1   :  { %555 = vperm.xlu1 %697, %v544_v31   ;;  %552 = vperm.xlu0 %696, %v543_v32   ;;  %v546_v34 = vadd.f32 %v538_v30, %v517_v33 }
 0x1f5   :  { %558 = vperm.xlu1 %697, %v545_v35   ;;  %561 = vperm.xlu0 %696, %v546_v34  }
 0x26c   :  { %v556_v36 = vpop.permute.xlu1 %555  ;;  %v553_v37 = vpop.permute.xlu0 %552 }
 0x26d   :  { %v572_v38 = vrot.slane %v556_v36, %v567_v18  ;;  %v568_v39 = vrot.slane %v553_v37, %v567_v18 }
 0x26f   :  { %v582_v44 = vsel %vm581_vm2, %v572_v38, %v568_v39 }
 0x270   :  { %v559_v40 = vpop.permute.xlu1 %558  ;;  %v562_v41 = vpop.permute.xlu0 %561 }
 0x271   :  { %v576_v42 = vrot.slane %v559_v40, %v567_v18  ;;  %v580_v43 = vrot.slane %v562_v41, %v567_v18 }
 0x273   :  { %v584_v45 = vsel %vm583_vm3, %v576_v42, %v582_v44 }
 0x274   :  { %v586_v46 = vsel %vm585_vm4, %v580_v43, %v584_v45 }
 0x275   :  { %589 = vst.msk [vmem:[#allocation5] sm:$0xf] %vm588_vm5, %v586_v46 }
 0x276   :  { %729 = shalt.err (!%p726_p9)
}
 0x277   :  { %599 = dma.vmem_to_hbm [thread:$0]  %s597_s6, 64, %s897_s7, [#allocation4]  }
 0x278   :  { %740 = dma.done.wait [#allocation4], 64  }
 0x279   :  { %741 = vsyncadd [#allocation4], 4294967232 }
 0x27a   :  { %603 = vsyncpa [#allocation3], 1 }
 0x27b   :  { %604 = vsyncpa [#allocation4], 1 }

</bundles_post_ra>
